<compile_context>
chip_gen: v7x
topology: tpu7x:2x2x1
jax: 0.10.0
libtpu: 0.0.40
codegen_flags: <defaults>
</compile_context>

<pallas_src>
import functools

import jax
import jax.numpy as jnp
from jax import lax
from jax.experimental import pallas as pl
from jax.experimental.pallas import tpu as pltpu

LANE = 128
_H_RESIDENT_BUDGET = 8 << 20   # bytes of VMEM allowed for a fully-resident H


def _round_up(x, m):
    return (x + m - 1) // m * m


def _pick_tile(n, preferred):
    for t in preferred:
        if t <= n and n % t == 0:
            return t
    return n


# ----------------------------------------------------------------------------
# Kernel 1: d = rsqrt(deg) with zero-degree guard; deg = adj.sum(axis=1).
# 2-D grid: rows "parallel", columns (reduction) "arbitrary" with an f32
# accumulator — VMEM use is flat in N (no full (tm, N) row band resident).
# ----------------------------------------------------------------------------
def _deg_rsqrt_kernel(adj_ref, d_ref, acc_ref):
    k = pl.program_id(1)
    part = jnp.sum(adj_ref[...].astype(jnp.float32), axis=1, keepdims=True)

    @pl.when(k == 0)
    def _():
        acc_ref[...] = part

    @pl.when(k != 0)
    def _():
        acc_ref[...] += part

    @pl.when(k == pl.num_programs(1) - 1)
    def _():
        deg = acc_ref[...]
        d_ref[...] = jnp.where(deg > 0.0, lax.rsqrt(deg), 0.0)


def degree_rsqrt(adj_i8):
    n = adj_i8.shape[0]
    tm = _pick_tile(n, (512, 256, 128))
    tk = _pick_tile(n, (2048, 1024, 512, 256, 128))
    return pl.pallas_call(
        _deg_rsqrt_kernel,
        out_shape=jax.ShapeDtypeStruct((n, 1), jnp.float32),
        grid_spec=pl.GridSpec(
            grid=(n // tm, n // tk),
            in_specs=[pl.BlockSpec((tm, tk), lambda i, k: (i, k))],
            out_specs=pl.BlockSpec((tm, 1), lambda i, k: (i, 0)),
            scratch_shapes=[pltpu.VMEM((tm, 1), jnp.float32)],
        ),
        compiler_params=pltpu.CompilerParams(
            dimension_semantics=("parallel", "arbitrary")),
    )(adj_i8)


# ----------------------------------------------------------------------------
# Kernel 2: feature transform, computed once per layer (hoisted).
#   H = d_col * (X @ W)      (MXU bf16 in / f32 acc, then scaled, stored bf16)
# ----------------------------------------------------------------------------
def _xform_kernel(x_ref, w_ref, d_ref, h_ref):
    h = jnp.dot(x_ref[...], w_ref[...], preferred_element_type=jnp.float32)
    h_ref[...] = (h * d_ref[...]).astype(h_ref.dtype)


def feature_transform(x_bf16, w_bf16, d):
    n, cin = x_bf16.shape
    cout = w_bf16.shape[1]
    tm = _pick_tile(n, (1024, 512, 256, 128))
    return pl.pallas_call(
        _xform_kernel,
        out_shape=jax.ShapeDtypeStruct((n, cout), jnp.bfloat16),
        grid_spec=pl.GridSpec(
            grid=(n // tm,),
            in_specs=[
                pl.BlockSpec((tm, cin), lambda i: (i, 0)),    # x row tile
                pl.BlockSpec((cin, cout), lambda i: (0, 0)),  # W (resident)
                pl.BlockSpec((tm, 1), lambda i: (i, 0)),      # d for these rows
            ],
            out_specs=pl.BlockSpec((tm, cout), lambda i: (i, 0)),
        ),
        compiler_params=pltpu.CompilerParams(dimension_semantics=("parallel",)),
    )(x_bf16, w_bf16, d)


# ----------------------------------------------------------------------------
# Kernel 3: neighbor aggregation (K-tiled reduction on the MXU).
#   acc[i, :] (+)= adj_i8[i, k_tile] -> bf16  @  H[k_tile, :]
#   out[i, :]  = maybe_relu( d[i] * acc[i, :] + bias )          (finalize)
# ----------------------------------------------------------------------------
def _agg_kernel(adj_ref, h_ref, b_ref, drow_ref, o_ref, acc_ref, *,
                apply_relu, tk, h_resident):
    k = pl.program_id(1)
    adj = adj_ref[...].astype(jnp.bfloat16)      # int8 -> bf16 (VPU, hidden under DMA)
    if h_resident:
        start = pl.multiple_of(k * tk, tk)
        h = h_ref[pl.ds(start, tk), :]           # H fully resident; slice this k tile
    else:
        h = h_ref[...]                           # streamed (tk, cout) tile
    part = jnp.dot(adj, h, preferred_element_type=jnp.float32)

    @pl.when(k == 0)
    def _():
        acc_ref[...] = part                      # write-first, no zero-fill + add

    @pl.when(k != 0)
    def _():
        acc_ref[...] += part

    @pl.when(k == pl.num_programs(1) - 1)
    def _():
        out = acc_ref[...] * drow_ref[...] + b_ref[...]
        if apply_relu:
            out = jnp.maximum(out, 0.0)
        o_ref[...] = out.astype(o_ref.dtype)


def aggregate(adj_i8, h_bf16, bias_f32_2d, d, *, apply_relu, out_dtype):
    n = adj_i8.shape[0]
    cout = h_bf16.shape[1]
    tm = _pick_tile(n, (1024, 512, 256, 128))     # output-row tile
    tk = _pick_tile(n, (2048, 1024, 512, 256, 128))  # neighbor (reduction) tile

    h_bytes_resident = n * cout * 2
    h_resident = h_bytes_resident <= _H_RESIDENT_BUDGET
    if h_resident:
        h_spec = pl.BlockSpec((n, cout), lambda i, k: (0, 0))     # resident once
    else:
        h_spec = pl.BlockSpec((tk, cout), lambda i, k: (k, 0))    # streamed

    out_bytes = jnp.dtype(out_dtype).itemsize
    budget = (
        2 * tm * tk                                               # adj int8, dbl-buffered
        + (h_bytes_resident if h_resident else 2 * tk * cout * 2)
        + tm * cout * 4                                           # f32 accumulator
        + 2 * tm * cout * out_bytes                               # output, dbl-buffered
        + (1 << 20)                                               # bias / d / slack
    )
    # Modest explicit limit: above v5e's 16 MiB default, well under v7x's 64 MiB.
    vmem_limit = int(min(max(budget * 5 // 4, 32 << 20), 48 << 20))

    kernel = functools.partial(
        _agg_kernel, apply_relu=apply_relu, tk=tk, h_resident=h_resident)
    return pl.pallas_call(
        kernel,
        out_shape=jax.ShapeDtypeStruct((n, cout), out_dtype),
        grid_spec=pl.GridSpec(
            grid=(n // tm, n // tk),
            in_specs=[
                pl.BlockSpec((tm, tk), lambda i, k: (i, k)),   # adj tile (int8)
                h_spec,                                        # H (resident or tiled)
                pl.BlockSpec((1, cout), lambda i, k: (0, 0)),  # bias
                pl.BlockSpec((tm, 1), lambda i, k: (i, 0)),    # d for output rows
            ],
            out_specs=pl.BlockSpec((tm, cout), lambda i, k: (i, 0)),
            scratch_shapes=[pltpu.VMEM((tm, cout), jnp.float32)],
        ),
        compiler_params=pltpu.CompilerParams(
            dimension_semantics=("parallel", "arbitrary"),
            vmem_limit_bytes=vmem_limit,
        ),
    )(adj_i8, h_bf16, bias_f32_2d, d)


# ----------------------------------------------------------------------------
# GCN module (forward only, inference semantics)
# ----------------------------------------------------------------------------
def init_gcn_params(key, in_channels, hidden_channels, out_channels, num_layers):
    dims = [in_channels] + [hidden_channels] * (num_layers - 1) + [out_channels]
    params = []
    for li in range(num_layers):
        cin, cout = dims[li], dims[li + 1]
        key, kw = jax.random.split(key)
        scale = jnp.sqrt(6.0 / (cin + cout))
        w = jax.random.uniform(kw, (cin, cout), jnp.float32, -scale, scale)
        b = jnp.zeros((cout,), jnp.float32)
        params.append((w, b))
    return params


def gcn_forward(params, x, adj, dropout=0.5):
    n, cin = x.shape
    n_pad = _round_up(n, LANE)

    # int8 adjacency (0/1/2 entries are exact); padded rows/cols are zero so
    # padded nodes get d = 0 and contribute nothing.
    adj_p = jnp.pad(adj, ((0, n_pad - n), (0, n_pad - n))).astype(jnp.int8)
    d = degree_rsqrt(adj_p)                                  # [n_pad, 1] f32

    cin_pad = _round_up(cin, LANE)
    h = jnp.pad(x, ((0, n_pad - n), (0, cin_pad - cin))).astype(jnp.bfloat16)

    num_layers = len(params)
    for li, (w, b) in enumerate(params):
        last = li == num_layers - 1
        ci, co = w.shape
        ci_pad = _round_up(ci, LANE)
        co_pad = _round_up(co, LANE)
        w_p = jnp.pad(w, ((0, ci_pad - ci), (0, co_pad - co))).astype(jnp.bfloat16)
        b_p = jnp.pad(b, (0, co_pad - co)).astype(jnp.float32).reshape(1, co_pad)

        hw = feature_transform(h, w_p, d)      # H = d_col * (X @ W), once per layer
        h = aggregate(
            adj_p, hw, b_p, d,
            apply_relu=not last,
            out_dtype=jnp.float32 if last else jnp.bfloat16,
        )
        # F.dropout(..., training=False) == identity

    out_c = params[-1][0].shape[1]
    return h[:n, :out_c]


if __name__ == "__main__":
    key = jax.random.PRNGKey(0)
    k_x, k_adj, k_p = jax.random.split(key, 3)

    N = 200            # number of nodes (exercises node padding to 256)
    IN_C = 32
    HID_C = 64
    OUT_C = 16
    NUM_LAYERS = 3

    x = jax.random.normal(k_x, (N, IN_C), jnp.float32)

    # random symmetric adjacency with self-loops (dense)
    a = (jax.random.uniform(k_adj, (N, N)) < 0.05).astype(jnp.float32)
    adj = jnp.maximum(a, a.T) + jnp.eye(N, dtype=jnp.float32)

    params = init_gcn_params(k_p, IN_C, HID_C, OUT_C, NUM_LAYERS)

    out = gcn_forward(params, x, adj, dropout=0.5)
    out = jax.block_until_ready(out)
    assert out.shape == (N, OUT_C), out.shape
    assert bool(jnp.all(jnp.isfinite(out)))
    print("KERNEL_OK")
</pallas_src>

<mosaic_0001>
module attributes {stable_mosaic.version = 11 : i64} {
  func.func @_deg_rsqrt_kernel(%arg0: i32, %arg1: i32, %arg2: memref<256x256xi8, #tpu.memory_space<vmem>>, %arg3: memref<256x1xf32, #tpu.memory_space<vmem>>, %arg4: memref<256x1xf32, #tpu.memory_space<vmem>>) attributes {dimension_semantics = [#tpu.dimension_semantics<parallel>, #tpu.dimension_semantics<arbitrary>], iteration_bounds = array<i64: 1, 1>, scalar_prefetch = 0 : i64, scratch_operands = 1 : i64, tpu.core_type = #tpu.core_type<tc>, window_params = [{transform_indices = @transform_0, window_bounds = array<i64: 256, 256>}, {transform_indices = @transform_1, window_bounds = array<i64: 256, 1>}]} {
    %c0 = arith.constant 0 : index
    %c0_0 = arith.constant 0 : index
    %0 = vector.load %arg2[%c0, %c0_0] : memref<256x256xi8, #tpu.memory_space<vmem>>, vector<256x256xi8>
    %1 = arith.sitofp %0 : vector<256x256xi8> to vector<256x256xf32>
    %cst = arith.constant dense<0.000000e+00> : vector<256xf32>
    %2 = vector.multi_reduction <add>, %1, %cst [1] : vector<256x256xf32> to vector<256xf32>
    %3 = vector.shape_cast %2 : vector<256xf32> to vector<256x1xf32>
    %c0_i32 = arith.constant 0 : i32
    %4 = arith.cmpi eq, %arg1, %c0_i32 : i32
    %5 = arith.extui %4 : i1 to i32
    %c0_i32_1 = arith.constant 0 : i32
    %6 = arith.cmpi ne, %5, %c0_i32_1 : i32
    scf.if %6 {
      %c0_6 = arith.constant 0 : index
      %c0_7 = arith.constant 0 : index
      %13 = vector.load %arg4[%c0_6, %c0_7] : memref<256x1xf32, #tpu.memory_space<vmem>>, vector<256x1xf32>
      tpu.vector_store %arg4[%c0_6, %c0_7], %3 {strides = array<i32>} : memref<256x1xf32, #tpu.memory_space<vmem>>, vector<256x1xf32>,
    } else {
    }
    %c0_i32_2 = arith.constant 0 : i32
    %7 = arith.cmpi ne, %arg1, %c0_i32_2 : i32
    %8 = arith.extui %7 : i1 to i32
    %c0_i32_3 = arith.constant 0 : i32
    %9 = arith.cmpi ne, %8, %c0_i32_3 : i32
    scf.if %9 {
      %c0_6 = arith.constant 0 : index
      %c0_7 = arith.constant 0 : index
      %13 = vector.load %arg4[%c0_6, %c0_7] : memref<256x1xf32, #tpu.memory_space<vmem>>, vector<256x1xf32>
      %14 = arith.addf %13, %3 : vector<256x1xf32>
      %c0_8 = arith.constant 0 : index
      %c0_9 = arith.constant 0 : index
      %15 = vector.load %arg4[%c0_8, %c0_9] : memref<256x1xf32, #tpu.memory_space<vmem>>, vector<256x1xf32>
      tpu.vector_store %arg4[%c0_8, %c0_9], %14 {strides = array<i32>} : memref<256x1xf32, #tpu.memory_space<vmem>>, vector<256x1xf32>,
    } else {
    }
    %c0_i32_4 = arith.constant 0 : i32
    %10 = arith.cmpi eq, %arg1, %c0_i32_4 : i32
    %11 = arith.extui %10 : i1 to i32
    %c0_i32_5 = arith.constant 0 : i32
    %12 = arith.cmpi ne, %11, %c0_i32_5 : i32
    scf.if %12 {
      %c0_6 = arith.constant 0 : index
      %c0_7 = arith.constant 0 : index
      %13 = vector.load %arg4[%c0_6, %c0_7] : memref<256x1xf32, #tpu.memory_space<vmem>>, vector<256x1xf32>
      %cst_8 = arith.constant 0.000000e+00 : f32
      %14 = vector.broadcast %cst_8 : f32 to vector<256x1xf32>
      %15 = arith.cmpf ogt, %13, %14 : vector<256x1xf32>
      %16 = math.rsqrt %13 : vector<256x1xf32>
      %cst_9 = arith.constant 0.000000e+00 : f32
      %17 = vector.broadcast %cst_9 : f32 to vector<256x1xf32>
      %18 = arith.select %15, %16, %17 : vector<256x1xi1>, vector<256x1xf32>
      %c0_10 = arith.constant 0 : index
      %c0_11 = arith.constant 0 : index
      %19 = vector.load %arg3[%c0_10, %c0_11] : memref<256x1xf32, #tpu.memory_space<vmem>>, vector<256x1xf32>
      tpu.vector_store %arg3[%c0_10, %c0_11], %18 {strides = array<i32>} : memref<256x1xf32, #tpu.memory_space<vmem>>, vector<256x1xf32>,
    } else {
    }
    return
  }
  func.func @transform_0(%arg0: i32, %arg1: i32) -> (i32, i32) {
    %c0_i32 = arith.constant 0 : i32
    return %arg0, %arg1 : i32, i32
  }
  func.func @transform_1(%arg0: i32, %arg1: i32) -> (i32, i32) {
    %c0_i32 = arith.constant 0 : i32
    %c0_i32_0 = arith.constant 0 : i32
    return %arg0, %c0_i32 : i32, i32
  }
}

</mosaic_0001>

<bundles_post_ra>
// kernel: tpu_custom_call.1
= control target key start
LH: loop header
LB: loop body
LE: loop exit
PB: predicated region body
PF: predicated region fallthrough
CT: control target
= control target key end

     0   :  { %6 = vsyncpa [#allocation4], 0  ;;  %s660_s6 = smov [#allocation3]   ;;  %s845_s0 = inlined_call_operand.hbm [shape: s8[256,256], index: 0, kind: input, shape index: {}]   ;;  %s846_s1 = inlined_call_operand.vmem [shape: f32[256,1], index: 1, kind: output, shape index: {}]  }
   0x1   :  { %s12_s7 = sshll.u32 %s660_s6, 4  ;;  %s636_s10 = scalar_lea.hbm %s845_s0, 2048  ;;  %s13_s7 = int_to_ptr.vmem [resolvable:$true] %s12_s7 }
   0x2   :  { %p637_p0 = scmp.ne.s32.totalorder %s845_s0, %s636_s10  ;;  %p640_p1 = scmp.lt.u32.totalorder %s636_s10, %s845_s0 }
   0x4   :  { %p642_p2 = pnand %p640_p1, %p637_p0 }
   0x6   :  { %645 = shalt.err (!%p642_p2)
}
   0x7   :  { %s646_s15 = scalar_lea.vmem %s13_s7, 2048  ;;  %p651_p4 = scmp.lt.s32.totalorder %s13_s7, %s13_s7 }
   0x8   :  { %p647_p3 = scmp.ne.s32.totalorder %s13_s7, %s646_s15  ;;  %p652_p5 = scmp.lt.s32.totalorder %s646_s15, %s646_s15 }
   0xa   :  { %p653_p6 = por %p652_p5, %p651_p4 }
   0xc   :  { %p654_p7 = pnand %p653_p6, %p647_p3 }
   0xe   :  { %657 = shalt.err (!%p654_p7)
}
   0xf   :  { %s661_s16 = smov 256   ;;  %s662_s17 = smov 16  }
  0x10   :  { %18 = dma.hbm_to_vmem [thread:$0]  %s845_s0, 2048, %s13_s7, [#allocation4], %s661_s16, %s661_s16, %s662_s17  }
  0x11   :  { %658 = dma.done.wait [#allocation4], 2048  }
  0x12   :  { %659 = vsyncadd [#allocation4], 4294965248  ;;  %v22_v0 = vld [vmem:[#allocation3] sm:$0xff]  ;;  %v23_v1 = vld [vmem:[#allocation3 + $0x8] sm:$0xff]  ;;  %vm266_vm0 = vcmask 7168  }
  0x13   :  { %v42_v2 = vunpack.c.2.s8 %v22_v0  ;;  %v43_v3 = vunpack.c.2.s8 %v23_v1  ;;  %v38_v4 = vunpack.c.0.s8 %v22_v0  ;;  %v39_v5 = vunpack.c.0.s8 %v23_v1  ;;  %v24_v10 = vld [vmem:[#allocation3 + $0x10] sm:$0xff]  ;;  %v25_v11 = vld [vmem:[#allocation3 + $0x18] sm:$0xff]  ;;  %v26_v28 = vld [vmem:[#allocation3 + $0x20] sm:$0xff] }
  0x14   :  { %v44_v6 = vunpack.c.3.s8 %v22_v0  ;;  %v45_v7 = vunpack.c.3.s8 %v23_v1  ;;  %v40_v8 = vunpack.c.1.s8 %v22_v0  ;;  %v41_v9 = vunpack.c.1.s8 %v23_v1  ;;  %v27_v33 = vld [vmem:[#allocation3 + $0x28] sm:$0xff]  ;;  %v28_v58 = vld [vmem:[#allocation3 + $0x30] sm:$0xff]  ;;  %v29_v59 = vld [vmem:[#allocation3 + $0x38] sm:$0xff] }
  0x15   :  { %v106_v12 = vcvt.s32.f32 %v42_v2  ;;  %v107_v13 = vcvt.s32.f32 %v43_v3  ;;  %v102_v14 = vcvt.s32.f32 %v38_v4  ;;  %v103_v15 = vcvt.s32.f32 %v39_v5 }
  0x16   :  { %v108_v16 = vcvt.s32.f32 %v44_v6  ;;  %v109_v17 = vcvt.s32.f32 %v45_v7  ;;  %v104_v18 = vcvt.s32.f32 %v40_v8  ;;  %v105_v19 = vcvt.s32.f32 %v41_v9 }
  0x17   :  { %v172_v20 = vadd.f32 %v107_v13, %v106_v12  ;;  %v166_v21 = vadd.f32 %v103_v15, %v102_v14  ;;  %v48_v22 = vunpack.c.1.s8 %v24_v10  ;;  %v49_v23 = vunpack.c.1.s8 %v25_v11  ;;  %v30_v12 = vld [vmem:[#allocation3 + $0x40] sm:$0xff] }
  0x18   :  { %v175_v24 = vadd.f32 %v109_v17, %v108_v16  ;;  %v169_v25 = vadd.f32 %v105_v19, %v104_v18  ;;  %v46_v26 = vunpack.c.0.s8 %v24_v10  ;;  %v47_v27 = vunpack.c.0.s8 %v25_v11  ;;  %v31_v17 = vld [vmem:[#allocation3 + $0x48] sm:$0xff] }
  0x19   :  { %173 = vadd.xlane.f32.xlu1 %v172_v20  ;;  %167 = vadd.xlane.f32.xlu0 %v166_v21  ;;  %v112_v29 = vcvt.s32.f32 %v48_v22  ;;  %v113_v30 = vcvt.s32.f32 %v49_v23  ;;  %v52_v31 = vunpack.c.3.s8 %v24_v10  ;;  %v53_v32 = vunpack.c.3.s8 %v25_v11 }
  0x1a   :  { %v110_v34 = vcvt.s32.f32 %v46_v26  ;;  %v111_v35 = vcvt.s32.f32 %v47_v27  ;;  %v50_v36 = vunpack.c.2.s8 %v24_v10  ;;  %v51_v37 = vunpack.c.2.s8 %v25_v11 }
  0x1b   :  { %v181_v38 = vadd.f32 %v113_v30, %v112_v29  ;;  %v56_v39 = vunpack.c.1.s8 %v26_v28  ;;  %v116_v41 = vcvt.s32.f32 %v52_v31  ;;  %v117_v42 = vcvt.s32.f32 %v53_v32 }
  0x1c   :  { %v178_v40 = vadd.f32 %v111_v35, %v110_v34  ;;  %v57_v43 = vunpack.c.1.s8 %v27_v33  ;;  %v114_v44 = vcvt.s32.f32 %v50_v36  ;;  %v115_v45 = vcvt.s32.f32 %v51_v37  ;;  %v32_v34 = vld [vmem:[#allocation3 + $0x50] sm:$0xff]  ;;  %v33_v35 = vld [vmem:[#allocation3 + $0x58] sm:$0xff] }
  0x1d   :  { %176 = vadd.xlane.f32.xlu1 %v175_v24  ;;  %170 = vadd.xlane.f32.xlu0 %v169_v25  ;;  %v54_v46 = vunpack.c.0.s8 %v26_v28  ;;  %v55_v47 = vunpack.c.0.s8 %v27_v33  ;;  %v120_v48 = vcvt.s32.f32 %v56_v39  ;;  %v60_v50 = vunpack.c.3.s8 %v26_v28 }
  0x1e   :  { %v121_v49 = vcvt.s32.f32 %v57_v43  ;;  %v61_v53 = vunpack.c.3.s8 %v27_v33  ;;  %v58_v54 = vunpack.c.2.s8 %v26_v28  ;;  %v187_v55 = vadd.f32 %v117_v42, %v116_v41 }
  0x1f   :  { %v118_v51 = vcvt.s32.f32 %v54_v46  ;;  %v119_v52 = vcvt.s32.f32 %v55_v47  ;;  %v184_v56 = vadd.f32 %v115_v45, %v114_v44  ;;  %v59_v57 = vunpack.c.2.s8 %v27_v33 }
  0x20   :  { %v193_v60 = vadd.f32 %v121_v49, %v120_v48  ;;  %v124_v61 = vcvt.s32.f32 %v60_v50  ;;  %v125_v63 = vcvt.s32.f32 %v61_v53  ;;  %v122_v0 = vcvt.s32.f32 %v58_v54 }
  0x21   :  { %182 = vadd.xlane.f32.xlu1 %v181_v38  ;;  %179 = vadd.xlane.f32.xlu0 %v178_v40  ;;  %v190_v62 = vadd.f32 %v119_v52, %v118_v51  ;;  %v64_v1 = vunpack.c.1.s8 %v28_v58  ;;  %v123_v2 = vcvt.s32.f32 %v59_v57  ;;  %v65_v3 = vunpack.c.1.s8 %v29_v59 }
  0x22   :  { %v62_v4 = vunpack.c.0.s8 %v28_v58  ;;  %v63_v5 = vunpack.c.0.s8 %v29_v59  ;;  %v68_v6 = vunpack.c.3.s8 %v28_v58  ;;  %v69_v7 = vunpack.c.3.s8 %v29_v59 }
  0x23   :  { %v199_v8 = vadd.f32 %v125_v63, %v124_v61  ;;  %v128_v9 = vcvt.s32.f32 %v64_v1  ;;  %v66_v10 = vunpack.c.2.s8 %v28_v58  ;;  %v67_v11 = vunpack.c.2.s8 %v29_v59  ;;  %v35_v61 = vld [vmem:[#allocation3 + $0x68] sm:$0xff] }
  0x24   :  { %v196_v13 = vadd.f32 %v123_v2, %v122_v0  ;;  %v129_v14 = vcvt.s32.f32 %v65_v3  ;;  %v126_v15 = vcvt.s32.f32 %v62_v4  ;;  %v127_v16 = vcvt.s32.f32 %v63_v5 }
  0x25   :  { %188 = vadd.xlane.f32.xlu1 %v187_v55  ;;  %185 = vadd.xlane.f32.xlu0 %v184_v56  ;;  %v132_v18 = vcvt.s32.f32 %v68_v6  ;;  %v133_v19 = vcvt.s32.f32 %v69_v7  ;;  %v72_v20 = vunpack.c.1.s8 %v30_v12  ;;  %v130_v21 = vcvt.s32.f32 %v66_v10 }
  0x26   :  { %v131_v22 = vcvt.s32.f32 %v67_v11  ;;  %v73_v23 = vunpack.c.1.s8 %v31_v17  ;;  %v205_v24 = vadd.f32 %v129_v14, %v128_v9  ;;  %v202_v25 = vadd.f32 %v127_v16, %v126_v15  ;;  %v36_v14 = vld [vmem:[#allocation3 + $0x70] sm:$0xff] }
  0x27   :  { %v70_v26 = vunpack.c.0.s8 %v30_v12  ;;  %v71_v27 = vunpack.c.0.s8 %v31_v17  ;;  %v211_v28 = vadd.f32 %v133_v19, %v132_v18  ;;  %v136_v29 = vcvt.s32.f32 %v72_v20  ;;  %v37_v19 = vld [vmem:[#allocation3 + $0x78] sm:$0xff] }
  0x28   :  { %v208_v30 = vadd.f32 %v131_v22, %v130_v21  ;;  %v137_v31 = vcvt.s32.f32 %v73_v23  ;;  %v76_v32 = vunpack.c.3.s8 %v30_v12  ;;  %v77_v33 = vunpack.c.3.s8 %v31_v17 }
  0x29   :  { %194 = vadd.xlane.f32.xlu1 %v193_v60  ;;  %191 = vadd.xlane.f32.xlu0 %v190_v62  ;;  %v134_v36 = vcvt.s32.f32 %v70_v26  ;;  %v135_v37 = vcvt.s32.f32 %v71_v27  ;;  %v74_v38 = vunpack.c.2.s8 %v30_v12  ;;  %v75_v39 = vunpack.c.2.s8 %v31_v17  ;;  %v34_v60 = vld [vmem:[#allocation3 + $0x60] sm:$0xff] }
  0x2a   :  { %v80_v40 = vunpack.c.1.s8 %v32_v34  ;;  %v81_v41 = vunpack.c.1.s8 %v33_v35  ;;  %v217_v42 = vadd.f32 %v137_v31, %v136_v29  ;;  %v140_v43 = vcvt.s32.f32 %v76_v32 }
  0x2b   :  { %v78_v44 = vunpack.c.0.s8 %v32_v34  ;;  %v79_v45 = vunpack.c.0.s8 %v33_v35  ;;  %v214_v46 = vadd.f32 %v135_v37, %v134_v36  ;;  %v141_v47 = vcvt.s32.f32 %v77_v33 }
  0x2c   :  { %v138_v48 = vcvt.s32.f32 %v74_v38  ;;  %v139_v49 = vcvt.s32.f32 %v75_v39  ;;  %v144_v50 = vcvt.s32.f32 %v80_v40  ;;  %v145_v51 = vcvt.s32.f32 %v81_v41 }
  0x2d   :  { %200 = vadd.xlane.f32.xlu1 %v199_v8  ;;  %197 = vadd.xlane.f32.xlu0 %v196_v13  ;;  %v84_v52 = vunpack.c.3.s8 %v32_v34  ;;  %v142_v53 = vcvt.s32.f32 %v78_v44  ;;  %v143_v54 = vcvt.s32.f32 %v79_v45  ;;  %v85_v55 = vunpack.c.3.s8 %v33_v35 }
  0x2e   :  { %v82_v56 = vunpack.c.2.s8 %v32_v34  ;;  %v223_v57 = vadd.f32 %v141_v47, %v140_v43  ;;  %v220_v58 = vadd.f32 %v139_v49, %v138_v48  ;;  %v83_v59 = vunpack.c.2.s8 %v33_v35 }
  0x2f   :  { %v229_v62 = vadd.f32 %v145_v51, %v144_v50  ;;  %v148_v63 = vcvt.s32.f32 %v84_v52  ;;  %v226_v0 = vadd.f32 %v143_v54, %v142_v53  ;;  %v149_v1 = vcvt.s32.f32 %v85_v55 }
  0x30   :  { %v146_v2 = vcvt.s32.f32 %v82_v56  ;;  %v88_v3 = vunpack.c.1.s8 %v34_v60  ;;  %v147_v4 = vcvt.s32.f32 %v83_v59  ;;  %v89_v5 = vunpack.c.1.s8 %v35_v61 }
  0x31   :  { %206 = vadd.xlane.f32.xlu1 %v205_v24  ;;  %203 = vadd.xlane.f32.xlu0 %v202_v25  ;;  %v86_v6 = vunpack.c.0.s8 %v34_v60  ;;  %v87_v7 = vunpack.c.0.s8 %v35_v61  ;;  %v92_v8 = vunpack.c.3.s8 %v34_v60  ;;  %v93_v9 = vunpack.c.3.s8 %v35_v61 }
  0x32   :  { %v235_v10 = vadd.f32 %v149_v1, %v148_v63  ;;  %v152_v11 = vcvt.s32.f32 %v88_v3  ;;  %v90_v12 = vunpack.c.2.s8 %v34_v60  ;;  %v91_v13 = vunpack.c.2.s8 %v35_v61 }
  0x33   :  { %v232_v15 = vadd.f32 %v147_v4, %v146_v2  ;;  %v153_v16 = vcvt.s32.f32 %v89_v5  ;;  %v150_v17 = vcvt.s32.f32 %v86_v6  ;;  %v151_v18 = vcvt.s32.f32 %v87_v7 }
  0x34   :  { %v156_v20 = vcvt.s32.f32 %v92_v8  ;;  %v157_v21 = vcvt.s32.f32 %v93_v9  ;;  %v96_v22 = vunpack.c.1.s8 %v36_v14  ;;  %v154_v23 = vcvt.s32.f32 %v90_v12 }
  0x35   :  { %212 = vadd.xlane.f32.xlu1 %v211_v28  ;;  %209 = vadd.xlane.f32.xlu0 %v208_v30  ;;  %v155_v24 = vcvt.s32.f32 %v91_v13  ;;  %v97_v25 = vunpack.c.1.s8 %v37_v19  ;;  %v241_v26 = vadd.f32 %v153_v16, %v152_v11  ;;  %v238_v27 = vadd.f32 %v151_v18, %v150_v17 }
  0x36   :  { %v94_v28 = vunpack.c.0.s8 %v36_v14  ;;  %v95_v29 = vunpack.c.0.s8 %v37_v19  ;;  %v247_v30 = vadd.f32 %v157_v21, %v156_v20  ;;  %v160_v31 = vcvt.s32.f32 %v96_v22 }
  0x37   :  { %v244_v32 = vadd.f32 %v155_v24, %v154_v23  ;;  %v161_v33 = vcvt.s32.f32 %v97_v25  ;;  %v100_v34 = vunpack.c.3.s8 %v36_v14  ;;  %v101_v35 = vunpack.c.3.s8 %v37_v19 }
  0x38   :  { %v158_v36 = vcvt.s32.f32 %v94_v28  ;;  %v159_v37 = vcvt.s32.f32 %v95_v29  ;;  %v98_v38 = vunpack.c.2.s8 %v36_v14  ;;  %v99_v39 = vunpack.c.2.s8 %v37_v19 }
  0x39   :  { %218 = vadd.xlane.f32.xlu1 %v217_v42  ;;  %215 = vadd.xlane.f32.xlu0 %v214_v46  ;;  %v253_v40 = vadd.f32 %v161_v33, %v160_v31  ;;  %v164_v41 = vcvt.s32.f32 %v100_v34  ;;  %v165_v43 = vcvt.s32.f32 %v101_v35 }
  0x3a   :  { %v250_v42 = vadd.f32 %v159_v37, %v158_v36  ;;  %v162_v44 = vcvt.s32.f32 %v98_v38  ;;  %v163_v45 = vcvt.s32.f32 %v99_v39 }
  0x3b   :  { %v259_v46 = vadd.f32 %v165_v43, %v164_v41 }
  0x3c   :  { %v256_v47 = vadd.f32 %v163_v45, %v162_v44 }
  0x3d   :  { %224 = vadd.xlane.f32.xlu1 %v223_v57  ;;  %221 = vadd.xlane.f32.xlu0 %v220_v58 }
  0x41   :  { %230 = vadd.xlane.f32.xlu1 %v229_v62  ;;  %227 = vadd.xlane.f32.xlu0 %v226_v0 }
  0x45   :  { %236 = vadd.xlane.f32.xlu1 %v235_v10  ;;  %233 = vadd.xlane.f32.xlu0 %v232_v15 }
  0x49   :  { %242 = vadd.xlane.f32.xlu1 %v241_v26  ;;  %239 = vadd.xlane.f32.xlu0 %v238_v27 }
  0x4d   :  { %248 = vadd.xlane.f32.xlu1 %v247_v30  ;;  %245 = vadd.xlane.f32.xlu0 %v244_v32 }
  0x51   :  { %254 = vadd.xlane.f32.xlu1 %v253_v40  ;;  %251 = vadd.xlane.f32.xlu0 %v250_v42 }
  0x55   :  { %260 = vadd.xlane.f32.xlu1 %v259_v46  ;;  %257 = vadd.xlane.f32.xlu0 %v256_v47 }
  0xa6   :  { %v174_v48 = vpop.xlane.xlu1 %173  ;;  %v168_v49 = vpop.xlane.xlu0 %167 }
  0xa7   :  { %269 = vst.msk [vmem:[#allocation2 + $0x10] sm:$0xff] %vm266_vm0, %v174_v48  ;;  %267 = vst.msk [vmem:[#allocation2] sm:$0xff] %vm266_vm0, %v168_v49 }
  0xaa   :  { %v177_v50 = vpop.xlane.xlu1 %176  ;;  %v171_v51 = vpop.xlane.xlu0 %170 }
  0xab   :  { %270 = vst.msk [vmem:[#allocation2 + $0x18] sm:$0xff] %vm266_vm0, %v177_v50  ;;  %268 = vst.msk [vmem:[#allocation2 + $0x8] sm:$0xff] %vm266_vm0, %v171_v51 }
  0xae   :  { %v405_v52 = vld [vmem:[#allocation2 + $0x10] sm:$0xff]  ;;  %v403_v53 = vld [vmem:[#allocation2] sm:$0xff]  ;;  %v183_v54 = vpop.xlane.xlu1 %182  ;;  %v180_v55 = vpop.xlane.xlu0 %179 }
  0xaf   :  { %572 = vrsqrt.f32 %v405_v52  ;;  %272 = vst.msk [vmem:[#allocation2 + $0x28] sm:$0xff] %vm266_vm0, %v183_v54  ;;  %271 = vst.msk [vmem:[#allocation2 + $0x20] sm:$0xff] %vm266_vm0, %v180_v55  ;;  %vm437_vm1 = vcmp.gt.f32.partialorder %v405_v52, 0.0  ;;  %vm435_vm2 = vcmp.gt.f32.partialorder %v403_v53, 0.0 }
  0xb0   :  { %574 = vrsqrt.f32 %v403_v53 }
  0xb2   :  { %v406_v56 = vld [vmem:[#allocation2 + $0x18] sm:$0xff]  ;;  %v404_v57 = vld [vmem:[#allocation2 + $0x8] sm:$0xff]  ;;  %v189_v58 = vpop.xlane.xlu1 %188  ;;  %v186_v59 = vpop.xlane.xlu0 %185 }
  0xb3   :  { %576 = vrsqrt.f32 %v406_v56  ;;  %274 = vst.msk [vmem:[#allocation2 + $0x38] sm:$0xff] %vm266_vm0, %v189_v58  ;;  %273 = vst.msk [vmem:[#allocation2 + $0x30] sm:$0xff] %vm266_vm0, %v186_v59  ;;  %vm438_vm3 = vcmp.gt.f32.partialorder %v406_v56, 0.0  ;;  %vm436_vm4 = vcmp.gt.f32.partialorder %v404_v57, 0.0 }
  0xb4   :  { %578 = vrsqrt.f32 %v404_v57 }
  0xb6   :  { %v408_v60 = vld [vmem:[#allocation2 + $0x28] sm:$0xff]  ;;  %v407_v61 = vld [vmem:[#allocation2 + $0x20] sm:$0xff]  ;;  %v195_v62 = vpop.xlane.xlu1 %194  ;;  %v192_v63 = vpop.xlane.xlu0 %191 }
  0xb7   :  { %580 = vrsqrt.f32 %v408_v60  ;;  %276 = vst.msk [vmem:[#allocation2 + $0x48] sm:$0xff] %vm266_vm0, %v195_v62  ;;  %275 = vst.msk [vmem:[#allocation2 + $0x40] sm:$0xff] %vm266_vm0, %v192_v63  ;;  %vm440_vm5 = vcmp.gt.f32.partialorder %v408_v60, 0.0  ;;  %vm439_vm6 = vcmp.gt.f32.partialorder %v407_v61, 0.0 }
  0xb8   :  { %582 = vrsqrt.f32 %v407_v61 }
  0xb9   :  { %v573_v0 = vpop.eup %572 }
  0xba   :  { %v575_v1 = vpop.eup %574  ;;  %v501_v2 = vsel %vm437_vm1, %v573_v0, 0.0  ;;  %v410_v3 = vld [vmem:[#allocation2 + $0x38] sm:$0xff]  ;;  %v409_v4 = vld [vmem:[#allocation2 + $0x30] sm:$0xff]  ;;  %v201_v5 = vpop.xlane.xlu1 %200 }
  0xbb   :  { %v198_v6 = vpop.xlane.xlu0 %197  ;;  %534 = vst.msk [vmem:[%s846_s1 + $0x10] sm:$0xff] %vm266_vm0, %v501_v2  ;;  %v499_v7 = vsel %vm435_vm2, %v575_v1, 0.0  ;;  %584 = vrsqrt.f32 %v410_v3  ;;  %278 = vst.msk [vmem:[#allocation2 + $0x58] sm:$0xff] %vm266_vm0, %v201_v5  ;;  %vm442_vm7 = vcmp.gt.f32.partialorder %v410_v3, 0.0  ;;  %vm441_vm8 = vcmp.gt.f32.partialorder %v409_v4, 0.0 }
  0xbc   :  { %277 = vst.msk [vmem:[#allocation2 + $0x50] sm:$0xff] %vm266_vm0, %v198_v6  ;;  %532 = vst.msk [vmem:[%s846_s1] sm:$0xff] %vm266_vm0, %v499_v7  ;;  %586 = vrsqrt.f32 %v409_v4 }
  0xbd   :  { %v577_v8 = vpop.eup %576 }
  0xbe   :  { %v579_v9 = vpop.eup %578  ;;  %v502_v10 = vsel %vm438_vm3, %v577_v8, 0.0  ;;  %v412_v11 = vld [vmem:[#allocation2 + $0x48] sm:$0xff]  ;;  %v411_v12 = vld [vmem:[#allocation2 + $0x40] sm:$0xff]  ;;  %v207_v13 = vpop.xlane.xlu1 %206 }
  0xbf   :  { %v204_v14 = vpop.xlane.xlu0 %203  ;;  %535 = vst.msk [vmem:[%s846_s1 + $0x18] sm:$0xff] %vm266_vm0, %v502_v10  ;;  %v500_v15 = vsel %vm436_vm4, %v579_v9, 0.0  ;;  %588 = vrsqrt.f32 %v412_v11  ;;  %280 = vst.msk [vmem:[#allocation2 + $0x68] sm:$0xff] %vm266_vm0, %v207_v13  ;;  %vm444_vm9 = vcmp.gt.f32.partialorder %v412_v11, 0.0  ;;  %vm443_vm10 = vcmp.gt.f32.partialorder %v411_v12, 0.0 }
  0xc0   :  { %279 = vst.msk [vmem:[#allocation2 + $0x60] sm:$0xff] %vm266_vm0, %v204_v14  ;;  %533 = vst.msk [vmem:[%s846_s1 + $0x8] sm:$0xff] %vm266_vm0, %v500_v15  ;;  %590 = vrsqrt.f32 %v411_v12 }
  0xc1   :  { %v581_v16 = vpop.eup %580 }
  0xc2   :  { %v583_v17 = vpop.eup %582  ;;  %v504_v18 = vsel %vm440_vm5, %v581_v16, 0.0  ;;  %v414_v19 = vld [vmem:[#allocation2 + $0x58] sm:$0xff]  ;;  %v213_v21 = vpop.xlane.xlu1 %212 }
  0xc3   :  { %v413_v20 = vld [vmem:[#allocation2 + $0x50] sm:$0xff]  ;;  %v210_v22 = vpop.xlane.xlu0 %209  ;;  %537 = vst.msk [vmem:[%s846_s1 + $0x28] sm:$0xff] %vm266_vm0, %v504_v18  ;;  %v503_v23 = vsel %vm439_vm6, %v583_v17, 0.0  ;;  %592 = vrsqrt.f32 %v414_v19  ;;  %282 = vst.msk [vmem:[#allocation2 + $0x78] sm:$0xff] %vm266_vm0, %v213_v21  ;;  %vm446_vm11 = vcmp.gt.f32.partialorder %v414_v19, 0.0 }
  0xc4   :  { %281 = vst.msk [vmem:[#allocation2 + $0x70] sm:$0xff] %vm266_vm0, %v210_v22  ;;  %536 = vst.msk [vmem:[%s846_s1 + $0x20] sm:$0xff] %vm266_vm0, %v503_v23  ;;  %594 = vrsqrt.f32 %v413_v20  ;;  %vm445_vm12 = vcmp.gt.f32.partialorder %v413_v20, 0.0 }
  0xc5   :  { %v585_v24 = vpop.eup %584 }
  0xc6   :  { %v587_v25 = vpop.eup %586  ;;  %v506_v26 = vsel %vm442_vm7, %v585_v24, 0.0  ;;  %v416_v27 = vld [vmem:[#allocation2 + $0x68] sm:$0xff]  ;;  %v219_v29 = vpop.xlane.xlu1 %218 }
  0xc7   :  { %v415_v28 = vld [vmem:[#allocation2 + $0x60] sm:$0xff]  ;;  %v216_v30 = vpop.xlane.xlu0 %215  ;;  %539 = vst.msk [vmem:[%s846_s1 + $0x38] sm:$0xff] %vm266_vm0, %v506_v26  ;;  %v505_v31 = vsel %vm441_vm8, %v587_v25, 0.0  ;;  %596 = vrsqrt.f32 %v416_v27  ;;  %284 = vst.msk [vmem:[#allocation2 + $0x88] sm:$0xff] %vm266_vm0, %v219_v29  ;;  %vm448_vm13 = vcmp.gt.f32.partialorder %v416_v27, 0.0 }
  0xc8   :  { %283 = vst.msk [vmem:[#allocation2 + $0x80] sm:$0xff] %vm266_vm0, %v216_v30  ;;  %538 = vst.msk [vmem:[%s846_s1 + $0x30] sm:$0xff] %vm266_vm0, %v505_v31  ;;  %598 = vrsqrt.f32 %v415_v28  ;;  %vm447_vm14 = vcmp.gt.f32.partialorder %v415_v28, 0.0 }
  0xc9   :  { %v589_v32 = vpop.eup %588 }
  0xca   :  { %v591_v33 = vpop.eup %590  ;;  %v508_v34 = vsel %vm444_vm9, %v589_v32, 0.0  ;;  %v418_v35 = vld [vmem:[#allocation2 + $0x78] sm:$0xff]  ;;  %v225_v37 = vpop.xlane.xlu1 %224 }
  0xcb   :  { %v417_v36 = vld [vmem:[#allocation2 + $0x70] sm:$0xff]  ;;  %v222_v38 = vpop.xlane.xlu0 %221  ;;  %541 = vst.msk [vmem:[%s846_s1 + $0x48] sm:$0xff] %vm266_vm0, %v508_v34  ;;  %v507_v39 = vsel %vm443_vm10, %v591_v33, 0.0  ;;  %600 = vrsqrt.f32 %v418_v35  ;;  %286 = vst.msk [vmem:[#allocation2 + $0x98] sm:$0xff] %vm266_vm0, %v225_v37  ;;  %vm450_vm15 = vcmp.gt.f32.partialorder %v418_v35, 0.0 }
  0xcc   :  { %285 = vst.msk [vmem:[#allocation2 + $0x90] sm:$0xff] %vm266_vm0, %v222_v38  ;;  %540 = vst.msk [vmem:[%s846_s1 + $0x40] sm:$0xff] %vm266_vm0, %v507_v39  ;;  %602 = vrsqrt.f32 %v417_v36  ;;  %vm449_vm1 = vcmp.gt.f32.partialorder %v417_v36, 0.0 }
  0xcd   :  { %v593_v40 = vpop.eup %592 }
  0xce   :  { %v595_v41 = vpop.eup %594  ;;  %v510_v42 = vsel %vm446_vm11, %v593_v40, 0.0  ;;  %v420_v43 = vld [vmem:[#allocation2 + $0x88] sm:$0xff]  ;;  %v231_v45 = vpop.xlane.xlu1 %230 }
  0xcf   :  { %v419_v44 = vld [vmem:[#allocation2 + $0x80] sm:$0xff]  ;;  %v228_v46 = vpop.xlane.xlu0 %227  ;;  %543 = vst.msk [vmem:[%s846_s1 + $0x58] sm:$0xff] %vm266_vm0, %v510_v42  ;;  %v509_v47 = vsel %vm445_vm12, %v595_v41, 0.0  ;;  %604 = vrsqrt.f32 %v420_v43  ;;  %288 = vst.msk [vmem:[#allocation2 + $0xa8] sm:$0xff] %vm266_vm0, %v231_v45  ;;  %vm452_vm2 = vcmp.gt.f32.partialorder %v420_v43, 0.0 }
  0xd0   :  { %287 = vst.msk [vmem:[#allocation2 + $0xa0] sm:$0xff] %vm266_vm0, %v228_v46  ;;  %542 = vst.msk [vmem:[%s846_s1 + $0x50] sm:$0xff] %vm266_vm0, %v509_v47  ;;  %606 = vrsqrt.f32 %v419_v44  ;;  %vm451_vm3 = vcmp.gt.f32.partialorder %v419_v44, 0.0 }
  0xd1   :  { %v597_v48 = vpop.eup %596 }
  0xd2   :  { %v599_v49 = vpop.eup %598  ;;  %v512_v50 = vsel %vm448_vm13, %v597_v48, 0.0  ;;  %v422_v51 = vld [vmem:[#allocation2 + $0x98] sm:$0xff]  ;;  %v237_v53 = vpop.xlane.xlu1 %236 }
  0xd3   :  { %v421_v52 = vld [vmem:[#allocation2 + $0x90] sm:$0xff]  ;;  %v234_v54 = vpop.xlane.xlu0 %233  ;;  %545 = vst.msk [vmem:[%s846_s1 + $0x68] sm:$0xff] %vm266_vm0, %v512_v50  ;;  %v511_v55 = vsel %vm447_vm14, %v599_v49, 0.0  ;;  %608 = vrsqrt.f32 %v422_v51  ;;  %290 = vst.msk [vmem:[#allocation2 + $0xb8] sm:$0xff] %vm266_vm0, %v237_v53  ;;  %vm454_vm4 = vcmp.gt.f32.partialorder %v422_v51, 0.0 }
  0xd4   :  { %289 = vst.msk [vmem:[#allocation2 + $0xb0] sm:$0xff] %vm266_vm0, %v234_v54  ;;  %544 = vst.msk [vmem:[%s846_s1 + $0x60] sm:$0xff] %vm266_vm0, %v511_v55  ;;  %610 = vrsqrt.f32 %v421_v52  ;;  %vm453_vm5 = vcmp.gt.f32.partialorder %v421_v52, 0.0 }
  0xd5   :  { %v601_v56 = vpop.eup %600 }
  0xd6   :  { %v603_v57 = vpop.eup %602  ;;  %v514_v58 = vsel %vm450_vm15, %v601_v56, 0.0  ;;  %v424_v59 = vld [vmem:[#allocation2 + $0xa8] sm:$0xff]  ;;  %v243_v61 = vpop.xlane.xlu1 %242 }
  0xd7   :  { %v423_v60 = vld [vmem:[#allocation2 + $0xa0] sm:$0xff]  ;;  %v240_v62 = vpop.xlane.xlu0 %239  ;;  %547 = vst.msk [vmem:[%s846_s1 + $0x78] sm:$0xff] %vm266_vm0, %v514_v58  ;;  %v513_v63 = vsel %vm449_vm1, %v603_v57, 0.0  ;;  %612 = vrsqrt.f32 %v424_v59  ;;  %292 = vst.msk [vmem:[#allocation2 + $0xc8] sm:$0xff] %vm266_vm0, %v243_v61  ;;  %vm456_vm6 = vcmp.gt.f32.partialorder %v424_v59, 0.0 }
  0xd8   :  { %291 = vst.msk [vmem:[#allocation2 + $0xc0] sm:$0xff] %vm266_vm0, %v240_v62  ;;  %546 = vst.msk [vmem:[%s846_s1 + $0x70] sm:$0xff] %vm266_vm0, %v513_v63  ;;  %614 = vrsqrt.f32 %v423_v60  ;;  %vm455_vm7 = vcmp.gt.f32.partialorder %v423_v60, 0.0 }
  0xd9   :  { %v605_v0 = vpop.eup %604 }
  0xda   :  { %v607_v1 = vpop.eup %606  ;;  %v516_v2 = vsel %vm452_vm2, %v605_v0, 0.0  ;;  %v426_v3 = vld [vmem:[#allocation2 + $0xb8] sm:$0xff]  ;;  %v249_v5 = vpop.xlane.xlu1 %248 }
  0xdb   :  { %v425_v4 = vld [vmem:[#allocation2 + $0xb0] sm:$0xff]  ;;  %v246_v6 = vpop.xlane.xlu0 %245  ;;  %549 = vst.msk [vmem:[%s846_s1 + $0x88] sm:$0xff] %vm266_vm0, %v516_v2  ;;  %v515_v7 = vsel %vm451_vm3, %v607_v1, 0.0  ;;  %616 = vrsqrt.f32 %v426_v3  ;;  %294 = vst.msk [vmem:[#allocation2 + $0xd8] sm:$0xff] %vm266_vm0, %v249_v5  ;;  %vm458_vm8 = vcmp.gt.f32.partialorder %v426_v3, 0.0 }
  0xdc   :  { %293 = vst.msk [vmem:[#allocation2 + $0xd0] sm:$0xff] %vm266_vm0, %v246_v6  ;;  %548 = vst.msk [vmem:[%s846_s1 + $0x80] sm:$0xff] %vm266_vm0, %v515_v7  ;;  %618 = vrsqrt.f32 %v425_v4  ;;  %vm457_vm9 = vcmp.gt.f32.partialorder %v425_v4, 0.0 }
  0xdd   :  { %v609_v8 = vpop.eup %608 }
  0xde   :  { %v611_v9 = vpop.eup %610  ;;  %v518_v10 = vsel %vm454_vm4, %v609_v8, 0.0  ;;  %v428_v11 = vld [vmem:[#allocation2 + $0xc8] sm:$0xff]  ;;  %v255_v13 = vpop.xlane.xlu1 %254 }
  0xdf   :  { %v427_v12 = vld [vmem:[#allocation2 + $0xc0] sm:$0xff]  ;;  %v252_v14 = vpop.xlane.xlu0 %251  ;;  %551 = vst.msk [vmem:[%s846_s1 + $0x98] sm:$0xff] %vm266_vm0, %v518_v10  ;;  %v517_v15 = vsel %vm453_vm5, %v611_v9, 0.0  ;;  %620 = vrsqrt.f32 %v428_v11  ;;  %296 = vst.msk [vmem:[#allocation2 + $0xe8] sm:$0xff] %vm266_vm0, %v255_v13  ;;  %vm460_vm10 = vcmp.gt.f32.partialorder %v428_v11, 0.0 }
  0xe0   :  { %295 = vst.msk [vmem:[#allocation2 + $0xe0] sm:$0xff] %vm266_vm0, %v252_v14  ;;  %550 = vst.msk [vmem:[%s846_s1 + $0x90] sm:$0xff] %vm266_vm0, %v517_v15  ;;  %622 = vrsqrt.f32 %v427_v12  ;;  %vm459_vm11 = vcmp.gt.f32.partialorder %v427_v12, 0.0 }
  0xe1   :  { %v613_v16 = vpop.eup %612 }
  0xe2   :  { %v615_v17 = vpop.eup %614  ;;  %v520_v18 = vsel %vm456_vm6, %v613_v16, 0.0  ;;  %v430_v19 = vld [vmem:[#allocation2 + $0xd8] sm:$0xff]  ;;  %v261_v21 = vpop.xlane.xlu1 %260 }
  0xe3   :  { %v429_v20 = vld [vmem:[#allocation2 + $0xd0] sm:$0xff]  ;;  %v258_v22 = vpop.xlane.xlu0 %257  ;;  %553 = vst.msk [vmem:[%s846_s1 + $0xa8] sm:$0xff] %vm266_vm0, %v520_v18  ;;  %v519_v23 = vsel %vm455_vm7, %v615_v17, 0.0  ;;  %624 = vrsqrt.f32 %v430_v19  ;;  %298 = vst.msk [vmem:[#allocation2 + $0xf8] sm:$0xff] %vm266_vm0, %v261_v21  ;;  %vm462_vm12 = vcmp.gt.f32.partialorder %v430_v19, 0.0 }
  0xe4   :  { %297 = vst.msk [vmem:[#allocation2 + $0xf0] sm:$0xff] %vm266_vm0, %v258_v22  ;;  %552 = vst.msk [vmem:[%s846_s1 + $0xa0] sm:$0xff] %vm266_vm0, %v519_v23  ;;  %626 = vrsqrt.f32 %v429_v20  ;;  %vm461_vm13 = vcmp.gt.f32.partialorder %v429_v20, 0.0 }
  0xe5   :  { %v617_v24 = vpop.eup %616 }
  0xe6   :  { %v619_v25 = vpop.eup %618  ;;  %v522_v26 = vsel %vm458_vm8, %v617_v24, 0.0  ;;  %v432_v27 = vld [vmem:[#allocation2 + $0xe8] sm:$0xff] }
  0xe7   :  { %v431_v28 = vld [vmem:[#allocation2 + $0xe0] sm:$0xff]  ;;  %555 = vst.msk [vmem:[%s846_s1 + $0xb8] sm:$0xff] %vm266_vm0, %v522_v26  ;;  %v521_v29 = vsel %vm457_vm9, %v619_v25, 0.0  ;;  %628 = vrsqrt.f32 %v432_v27  ;;  %vm464_vm14 = vcmp.gt.f32.partialorder %v432_v27, 0.0 }
  0xe8   :  { %554 = vst.msk [vmem:[%s846_s1 + $0xb0] sm:$0xff] %vm266_vm0, %v521_v29  ;;  %630 = vrsqrt.f32 %v431_v28  ;;  %vm463_vm15 = vcmp.gt.f32.partialorder %v431_v28, 0.0 }
  0xe9   :  { %v621_v30 = vpop.eup %620 }
  0xea   :  { %v623_v31 = vpop.eup %622  ;;  %v524_v32 = vsel %vm460_vm10, %v621_v30, 0.0  ;;  %v434_v33 = vld [vmem:[#allocation2 + $0xf8] sm:$0xff] }
  0xeb   :  { %v433_v34 = vld [vmem:[#allocation2 + $0xf0] sm:$0xff]  ;;  %557 = vst.msk [vmem:[%s846_s1 + $0xc8] sm:$0xff] %vm266_vm0, %v524_v32  ;;  %v523_v35 = vsel %vm459_vm11, %v623_v31, 0.0  ;;  %632 = vrsqrt.f32 %v434_v33  ;;  %vm466_vm1 = vcmp.gt.f32.partialorder %v434_v33, 0.0 }
  0xec   :  { %556 = vst.msk [vmem:[%s846_s1 + $0xc0] sm:$0xff] %vm266_vm0, %v523_v35  ;;  %634 = vrsqrt.f32 %v433_v34  ;;  %vm465_vm2 = vcmp.gt.f32.partialorder %v433_v34, 0.0 }
  0xed   :  { %v625_v36 = vpop.eup %624 }
  0xee   :  { %v627_v37 = vpop.eup %626  ;;  %v526_v38 = vsel %vm462_vm12, %v625_v36, 0.0 }
  0xef   :  { %559 = vst.msk [vmem:[%s846_s1 + $0xd8] sm:$0xff] %vm266_vm0, %v526_v38  ;;  %v525_v39 = vsel %vm461_vm13, %v627_v37, 0.0 }
  0xf0   :  { %558 = vst.msk [vmem:[%s846_s1 + $0xd0] sm:$0xff] %vm266_vm0, %v525_v39 }
  0xf1   :  { %v629_v40 = vpop.eup %628 }
  0xf2   :  { %v631_v41 = vpop.eup %630  ;;  %v528_v42 = vsel %vm464_vm14, %v629_v40, 0.0 }
  0xf3   :  { %561 = vst.msk [vmem:[%s846_s1 + $0xe8] sm:$0xff] %vm266_vm0, %v528_v42  ;;  %v527_v43 = vsel %vm463_vm15, %v631_v41, 0.0 }
  0xf4   :  { %560 = vst.msk [vmem:[%s846_s1 + $0xe0] sm:$0xff] %vm266_vm0, %v527_v43 }
  0xf5   :  { %v633_v44 = vpop.eup %632 }
  0xf6   :  { %v635_v45 = vpop.eup %634  ;;  %v530_v46 = vsel %vm466_vm1, %v633_v44, 0.0 }
  0xf7   :  { %563 = vst.msk [vmem:[%s846_s1 + $0xf8] sm:$0xff] %vm266_vm0, %v530_v46  ;;  %v529_v47 = vsel %vm465_vm2, %v635_v45, 0.0 }
  0xf8   :  { %562 = vst.msk [vmem:[%s846_s1 + $0xf0] sm:$0xff] %vm266_vm0, %v529_v47 }
  0xf9   :  { %568 = vsyncpa [#allocation4], 1 }

</bundles_post_ra>
